<compile_context>
chip_gen: v5e
topology: v5e:2x2
jax: 0.10.0
libtpu: 0.0.40
codegen_flags: <defaults>
</compile_context>

<pallas_src>
import math

import jax
import jax.numpy as jnp
from jax import lax
from jax.experimental import pallas as pl
from jax.experimental.pallas import tpu as pltpu

D_MODEL = 32
D_FF = 128
LN_EPS = 1e-5


def _gelu(x):
    # exact (erf-based) GELU, matching torch.nn.GELU() default
    return 0.5 * x * (1.0 + lax.erf(x * (1.0 / math.sqrt(2.0))))


def mlp_kernel(x_ref, gamma_ref, beta_ref, w1_ref, b1_ref,
               wpos_ref, bpos_ref, w2_ref, b2_ref, o_ref):
    Bb, L, D = x_ref.shape
    F = w1_ref.shape[1]
    n = Bb * L

    # Single flattened (Bb*L, D) slab in f32.
    x = x_ref[...].astype(jnp.float32).reshape(n, D)

    # Hoisted small params (loaded once per grid step).
    gamma = gamma_ref[...].astype(jnp.float32)          # (1, D)
    beta = beta_ref[...].astype(jnp.float32)            # (1, D)
    b1 = b1_ref[...].astype(jnp.float32)                # (1, F)
    bpos = bpos_ref[...].astype(jnp.float32)            # (1, F)
    b2 = b2_ref[...].astype(jnp.float32)                # (1, D)
    wpos = wpos_ref[...].astype(jnp.float32)            # (3, F)
    tap_m1 = wpos[0:1, :]                               # weight on x[l-1]
    tap_0 = wpos[1:2, :]                                # weight on x[l]
    tap_p1 = wpos[2:3, :]                               # weight on x[l+1]

    # ---- LayerNorm over channels ----
    mean = jnp.mean(x, axis=-1, keepdims=True)
    xc = x - mean
    var = jnp.mean(xc * xc, axis=-1, keepdims=True)
    xn = xc * lax.rsqrt(var + LN_EPS) * gamma + beta                  # (n, D)

    # ---- fc1: Conv1d(d_model, d_ff, 1) == channel matmul (bf16 in, f32 acc) ----
    h = jnp.dot(xn.astype(jnp.bfloat16), w1_ref[...].astype(jnp.bfloat16),
                preferred_element_type=jnp.float32) + b1              # (n, F)
    h = _gelu(h)

    # ---- pos: depthwise Conv1d(d_ff, d_ff, 3, padding=1) along L ----
    # XLU rolls + mask of rows that wrapped across a sequence boundary
    # (those positions must see zero padding).
    row = lax.broadcasted_iota(jnp.int32, (n, F), 0)
    pos_in_seq = row % L
    h_prev = jnp.where(pos_in_seq == 0, 0.0, pltpu.roll(h, 1, 0))
    h_next = jnp.where(pos_in_seq == L - 1, 0.0, pltpu.roll(h, n - 1, 0))
    conv = h_prev * tap_m1 + h * tap_0 + h_next * tap_p1 + bpos
    h = h + _gelu(conv)

    # ---- fc2: Conv1d(d_ff, d_model, 1) == channel matmul ----
    out = jnp.dot(h.astype(jnp.bfloat16), w2_ref[...].astype(jnp.bfloat16),
                  preferred_element_type=jnp.float32) + b2            # (n, D)

    # ---- write output already transposed: block is (Bb, D, L), lane axis = L ----
    for b in range(Bb):                                   # static unroll, small Bb
        o_ref[b] = out[b * L:(b + 1) * L, :].T.astype(o_ref.dtype)


def _pick_block_b(B, max_bb=8):
    """Largest batch block <= max_bb dividing B, preferring >=2 grid steps so
    v7x's second TensorCore gets work."""
    divisors = [bb for bb in range(1, min(max_bb, B) + 1) if B % bb == 0]
    two_plus = [bb for bb in divisors if B // bb >= 2]
    return max(two_plus) if two_plus else max(divisors)


def mlp_forward(x, params, *, block_b=None):
    """x: (B, L, d_model). Returns (B, d_model, L) — same as the PyTorch module."""
    B, L, D = x.shape
    gamma, beta, w1t, b1, wpos, bpos, w2t, b2 = params
    F = w1t.shape[1]
    if block_b is None:
        block_b = _pick_block_b(B)
    assert B % block_b == 0, (B, block_b)
    nb = B // block_b

    return pl.pallas_call(
        mlp_kernel,
        out_shape=jax.ShapeDtypeStruct((B, D, L), x.dtype),
        grid_spec=pltpu.PrefetchScalarGridSpec(
            num_scalar_prefetch=0,
            grid=(nb,),
            in_specs=[
                pl.BlockSpec((block_b, L, D), lambda i: (i, 0, 0)),   # x
                pl.BlockSpec((1, D), lambda i: (0, 0)),               # LN gamma
                pl.BlockSpec((1, D), lambda i: (0, 0)),               # LN beta
                pl.BlockSpec((D, F), lambda i: (0, 0)),               # fc1 weight^T
                pl.BlockSpec((1, F), lambda i: (0, 0)),               # fc1 bias
                pl.BlockSpec((3, F), lambda i: (0, 0)),               # depthwise taps
                pl.BlockSpec((1, F), lambda i: (0, 0)),               # depthwise bias
                pl.BlockSpec((F, D), lambda i: (0, 0)),               # fc2 weight^T
                pl.BlockSpec((1, D), lambda i: (0, 0)),               # fc2 bias
            ],
            out_specs=pl.BlockSpec((block_b, D, L), lambda i: (i, 0, 0)),
        ),
        compiler_params=pltpu.CompilerParams(
            dimension_semantics=("parallel",)),
    )(x, gamma, beta, w1t, b1, wpos, bpos, w2t, b2)


def _reference(x, params):
    gamma, beta, w1t, b1, wpos, bpos, w2t, b2 = params
    mean = jnp.mean(x, axis=-1, keepdims=True)
    var = jnp.mean((x - mean) ** 2, axis=-1, keepdims=True)
    xn = (x - mean) / jnp.sqrt(var + LN_EPS) * gamma[0] + beta[0]
    h = _gelu(xn @ w1t + b1[0])                                   # (B, L, F)
    hp = jnp.pad(h, ((0, 0), (1, 0), (0, 0)))[:, :-1]
    hn = jnp.pad(h, ((0, 0), (0, 1), (0, 0)))[:, 1:]
    conv = hp * wpos[0] + h * wpos[1] + hn * wpos[2] + bpos[0]
    h = h + _gelu(conv)
    out = h @ w2t + b2[0]                                         # (B, L, D)
    return jnp.transpose(out, (0, 2, 1))                          # (B, D, L)


def init_params(key):
    ks = jax.random.split(key, 6)
    gamma = jnp.ones((1, D_MODEL), jnp.float32)
    beta = jnp.zeros((1, D_MODEL), jnp.float32)
    # fc1: Conv1d(d_model, d_ff, 1) weight (d_ff, d_model, 1) -> stored transposed (d_model, d_ff)
    w1t = 0.1 * jax.random.normal(ks[0], (D_MODEL, D_FF), jnp.float32)
    b1 = 0.1 * jax.random.normal(ks[1], (1, D_FF), jnp.float32)
    # pos: Conv1d(d_ff, d_ff, 3, groups=d_ff) weight (d_ff, 1, 3) -> stored as (3, d_ff)
    wpos = 0.1 * jax.random.normal(ks[2], (3, D_FF), jnp.float32)
    bpos = 0.1 * jax.random.normal(ks[3], (1, D_FF), jnp.float32)
    # fc2: Conv1d(d_ff, d_model, 1) weight (d_model, d_ff, 1) -> stored transposed (d_ff, d_model)
    w2t = 0.1 * jax.random.normal(ks[4], (D_FF, D_MODEL), jnp.float32)
    b2 = 0.1 * jax.random.normal(ks[5], (1, D_MODEL), jnp.float32)
    return (gamma, beta, w1t, b1, wpos, bpos, w2t, b2)


if __name__ == "__main__":
    key = jax.random.PRNGKey(0)
    kx, kp = jax.random.split(key)
    B, L = 2, 8
    x = jax.random.normal(kx, (B, L, D_MODEL), jnp.float32)
    params = init_params(kp)

    ref = _reference(x, params)

    # Default batch blocking (Bb=1 here -> grid extent 2, both cores on v7x).
    out = jax.block_until_ready(mlp_forward(x, params))
    assert out.shape == (B, D_MODEL, L), out.shape
    # bf16 MXU operands (f32 accumulation) -> slightly looser tolerance vs f32 ref.
    assert jnp.allclose(out, ref, atol=2e-2, rtol=2e-2), "mismatch vs reference"

    # Also exercise the multi-batch-per-block path (sequence-boundary masking
    # inside a flattened (Bb*L, F) slab).
    out2 = jax.block_until_ready(mlp_forward(x, params, block_b=2))
    assert jnp.allclose(out2, ref, atol=2e-2, rtol=2e-2), "mismatch (block_b=2)"

    print("KERNEL_OK")
</pallas_src>

<mosaic_0001>
module attributes {stable_mosaic.version = 11 : i64} {
  func.func @mlp_kernel(%arg0: i32, %arg1: memref<1x8x32xf32, #tpu.memory_space<vmem>>, %arg2: memref<1x32xf32, #tpu.memory_space<vmem>>, %arg3: memref<1x32xf32, #tpu.memory_space<vmem>>, %arg4: memref<32x128xf32, #tpu.memory_space<vmem>>, %arg5: memref<1x128xf32, #tpu.memory_space<vmem>>, %arg6: memref<3x128xf32, #tpu.memory_space<vmem>>, %arg7: memref<1x128xf32, #tpu.memory_space<vmem>>, %arg8: memref<128x32xf32, #tpu.memory_space<vmem>>, %arg9: memref<1x32xf32, #tpu.memory_space<vmem>>, %arg10: memref<1x32x8xf32, #tpu.memory_space<vmem>>) attributes {dimension_semantics = [#tpu.dimension_semantics<parallel>], iteration_bounds = array<i64: 2>, scalar_prefetch = 0 : i64, scratch_operands = 0 : i64, tpu.core_type = #tpu.core_type<tc>, window_params = [{transform_indices = @transform_0, window_bounds = array<i64: 1, 8, 32>}, {pipeline_mode = #tpu.pipeline_mode<synchronous>, transform_indices = @transform_1, window_bounds = array<i64: 1, 32>}, {pipeline_mode = #tpu.pipeline_mode<synchronous>, transform_indices = @transform_2, window_bounds = array<i64: 1, 32>}, {pipeline_mode = #tpu.pipeline_mode<synchronous>, transform_indices = @transform_3, window_bounds = array<i64: 32, 128>}, {pipeline_mode = #tpu.pipeline_mode<synchronous>, transform_indices = @transform_4, window_bounds = array<i64: 1, 128>}, {pipeline_mode = #tpu.pipeline_mode<synchronous>, transform_indices = @transform_5, window_bounds = array<i64: 3, 128>}, {pipeline_mode = #tpu.pipeline_mode<synchronous>, transform_indices = @transform_6, window_bounds = array<i64: 1, 128>}, {pipeline_mode = #tpu.pipeline_mode<synchronous>, transform_indices = @transform_7, window_bounds = array<i64: 128, 32>}, {pipeline_mode = #tpu.pipeline_mode<synchronous>, transform_indices = @transform_8, window_bounds = array<i64: 1, 32>}, {transform_indices = @transform_9, window_bounds = array<i64: 1, 32, 8>}]} {
    %c0 = arith.constant 0 : index
    %c0_0 = arith.constant 0 : index
    %c0_1 = arith.constant 0 : index
    %0 = vector.load %arg1[%c0, %c0_0, %c0_1] : memref<1x8x32xf32, #tpu.memory_space<vmem>>, vector<1x8x32xf32>
    %1 = vector.shape_cast %0 : vector<1x8x32xf32> to vector<8x32xf32>
    %c0_2 = arith.constant 0 : index
    %c0_3 = arith.constant 0 : index
    %2 = vector.load %arg2[%c0_2, %c0_3] : memref<1x32xf32, #tpu.memory_space<vmem>>, vector<1x32xf32>
    %c0_4 = arith.constant 0 : index
    %c0_5 = arith.constant 0 : index
    %3 = vector.load %arg3[%c0_4, %c0_5] : memref<1x32xf32, #tpu.memory_space<vmem>>, vector<1x32xf32>
    %c0_6 = arith.constant 0 : index
    %c0_7 = arith.constant 0 : index
    %4 = vector.load %arg5[%c0_6, %c0_7] : memref<1x128xf32, #tpu.memory_space<vmem>>, vector<1x128xf32>
    %c0_8 = arith.constant 0 : index
    %c0_9 = arith.constant 0 : index
    %5 = vector.load %arg7[%c0_8, %c0_9] : memref<1x128xf32, #tpu.memory_space<vmem>>, vector<1x128xf32>
    %c0_10 = arith.constant 0 : index
    %c0_11 = arith.constant 0 : index
    %6 = vector.load %arg9[%c0_10, %c0_11] : memref<1x32xf32, #tpu.memory_space<vmem>>, vector<1x32xf32>
    %c0_12 = arith.constant 0 : index
    %c0_13 = arith.constant 0 : index
    %7 = vector.load %arg6[%c0_12, %c0_13] : memref<3x128xf32, #tpu.memory_space<vmem>>, vector<3x128xf32>
    %8 = vector.extract_strided_slice %7 {offsets = [0, 0], sizes = [1, 128], strides = [1, 1]} : vector<3x128xf32> to vector<1x128xf32>
    %9 = vector.extract_strided_slice %7 {offsets = [1, 0], sizes = [1, 128], strides = [1, 1]} : vector<3x128xf32> to vector<1x128xf32>
    %10 = vector.extract_strided_slice %7 {offsets = [2, 0], sizes = [1, 128], strides = [1, 1]} : vector<3x128xf32> to vector<1x128xf32>
    %cst = arith.constant dense<0.000000e+00> : vector<8xf32>
    %11 = vector.multi_reduction <add>, %1, %cst [1] : vector<8x32xf32> to vector<8xf32>
    %12 = vector.shape_cast %11 : vector<8xf32> to vector<8x1xf32>
    %cst_14 = arith.constant 3.200000e+01 : f32
    %13 = vector.broadcast %cst_14 : f32 to vector<8x1xf32>
    %14 = arith.divf %12, %13 : vector<8x1xf32>
    %15 = vector.broadcast %14 : vector<8x1xf32> to vector<8x32xf32>
    %16 = arith.subf %1, %15 : vector<8x32xf32>
    %17 = arith.mulf %16, %16 : vector<8x32xf32>
    %cst_15 = arith.constant dense<0.000000e+00> : vector<8xf32>
    %18 = vector.multi_reduction <add>, %17, %cst_15 [1] : vector<8x32xf32> to vector<8xf32>
    %19 = vector.shape_cast %18 : vector<8xf32> to vector<8x1xf32>
    %cst_16 = arith.constant 3.200000e+01 : f32
    %20 = vector.broadcast %cst_16 : f32 to vector<8x1xf32>
    %21 = arith.divf %19, %20 : vector<8x1xf32>
    %cst_17 = arith.constant 9.99999974E-6 : f32
    %22 = vector.broadcast %cst_17 : f32 to vector<8x1xf32>
    %23 = arith.addf %21, %22 : vector<8x1xf32>
    %24 = math.rsqrt %23 : vector<8x1xf32>
    %25 = vector.broadcast %24 : vector<8x1xf32> to vector<8x32xf32>
    %26 = arith.mulf %16, %25 : vector<8x32xf32>
    %27 = vector.broadcast %2 : vector<1x32xf32> to vector<8x32xf32>
    %28 = arith.mulf %26, %27 : vector<8x32xf32>
    %29 = vector.broadcast %3 : vector<1x32xf32> to vector<8x32xf32>
    %30 = arith.addf %28, %29 : vector<8x32xf32>
    %31 = arith.truncf %30 : vector<8x32xf32> to vector<8x32xbf16>
    %c0_18 = arith.constant 0 : index
    %c0_19 = arith.constant 0 : index
    %32 = vector.load %arg4[%c0_18, %c0_19] : memref<32x128xf32, #tpu.memory_space<vmem>>, vector<32x128xf32>
    %33 = arith.truncf %32 : vector<32x128xf32> to vector<32x128xbf16>
    %cst_20 = arith.constant dense<0.000000e+00> : vector<8x128xf32>
    %34 = tpu.matmul %31, %33, %cst_20 {dimension_numbers = #tpu.dot_dimension_numbers<[1], [0], [0], [1], [0, 0, 1, 1], [], []>} : vector<8x32xbf16>, vector<32x128xbf16>, vector<8x128xf32> -> vector<8x128xf32>
    %35 = vector.broadcast %4 : vector<1x128xf32> to vector<8x128xf32>
    %36 = arith.addf %34, %35 : vector<8x128xf32>
    %cst_21 = arith.constant 5.000000e-01 : f32
    %37 = vector.broadcast %cst_21 : f32 to vector<8x128xf32>
    %38 = arith.mulf %37, %36 : vector<8x128xf32>
    %cst_22 = arith.constant 0.707106769 : f32
    %39 = vector.broadcast %cst_22 : f32 to vector<8x128xf32>
    %40 = arith.mulf %36, %39 : vector<8x128xf32>
    %41 = math.erf %40 : vector<8x128xf32>
    %cst_23 = arith.constant 1.000000e+00 : f32
    %42 = vector.broadcast %cst_23 : f32 to vector<8x128xf32>
    %43 = arith.addf %42, %41 : vector<8x128xf32>
    %44 = arith.mulf %38, %43 : vector<8x128xf32>
    %45 = tpu.iota {dimensions = array<i32: 0>} : vector<8x128xi32>
    %c8_i32 = arith.constant 8 : i32
    %c0_i32 = arith.constant 0 : i32
    %46 = arith.cmpi eq, %c8_i32, %c0_i32 : i32
    %c1_i32 = arith.constant 1 : i32
    %47 = arith.select %46, %c1_i32, %c8_i32 : i32
    %48 = vector.broadcast %47 : i32 to vector<8x128xi32>
    %49 = arith.remsi %45, %48 : vector<8x128xi32>
    %c0_i32_24 = arith.constant 0 : i32
    %50 = vector.broadcast %c0_i32_24 : i32 to vector<8x128xi32>
    %51 = arith.cmpi ne, %49, %50 : vector<8x128xi32>
    %c0_i32_25 = arith.constant 0 : i32
    %52 = vector.broadcast %c0_i32_25 : i32 to vector<8x128xi32>
    %53 = arith.cmpi slt, %49, %52 : vector<8x128xi32>
    %c0_i32_26 = arith.constant 0 : i32
    %54 = arith.cmpi slt, %47, %c0_i32_26 : i32
    %55 = vector.broadcast %54 : i1 to vector<8x128xi1>
    %56 = vector.broadcast %55 : vector<8x128xi1> to vector<8x128xi1>
    %57 = arith.xori %53, %56 : vector<8x128xi1>
    %58 = arith.andi %57, %51 : vector<8x128xi1>
    %59 = vector.broadcast %47 : i32 to vector<8x128xi32>
    %60 = arith.addi %49, %59 : vector<8x128xi32>
    %61 = arith.select %58, %60, %49 : vector<8x128xi1>, vector<8x128xi32>
    %c0_i32_27 = arith.constant 0 : i32
    %62 = vector.broadcast %c0_i32_27 : i32 to vector<8x128xi32>
    %63 = arith.cmpi eq, %61, %62 : vector<8x128xi32>
    %c1_i32_28 = arith.constant 1 : i32
    %64 = tpu.dynamic_rotate %44 by %c1_i32_28 dim 0 : vector<8x128xf32>, i32 -> vector<8x128xf32>
    %cst_29 = arith.constant 0.000000e+00 : f32
    %65 = vector.broadcast %cst_29 : f32 to vector<8x128xf32>
    %66 = arith.select %63, %65, %64 : vector<8x128xi1>, vector<8x128xf32>
    %c7_i32 = arith.constant 7 : i32
    %67 = vector.broadcast %c7_i32 : i32 to vector<8x128xi32>
    %68 = arith.cmpi eq, %61, %67 : vector<8x128xi32>
    %c7_i32_30 = arith.constant 7 : i32
    %69 = tpu.dynamic_rotate %44 by %c7_i32_30 dim 0 : vector<8x128xf32>, i32 -> vector<8x128xf32>
    %cst_31 = arith.constant 0.000000e+00 : f32
    %70 = vector.broadcast %cst_31 : f32 to vector<8x128xf32>
    %71 = arith.select %68, %70, %69 : vector<8x128xi1>, vector<8x128xf32>
    %72 = vector.broadcast %8 : vector<1x128xf32> to vector<8x128xf32>
    %73 = arith.mulf %66, %72 : vector<8x128xf32>
    %74 = vector.broadcast %9 : vector<1x128xf32> to vector<8x128xf32>
    %75 = arith.mulf %44, %74 : vector<8x128xf32>
    %76 = arith.addf %73, %75 : vector<8x128xf32>
    %77 = vector.broadcast %10 : vector<1x128xf32> to vector<8x128xf32>
    %78 = arith.mulf %71, %77 : vector<8x128xf32>
    %79 = arith.addf %76, %78 : vector<8x128xf32>
    %80 = vector.broadcast %5 : vector<1x128xf32> to vector<8x128xf32>
    %81 = arith.addf %79, %80 : vector<8x128xf32>
    %cst_32 = arith.constant 5.000000e-01 : f32
    %82 = vector.broadcast %cst_32 : f32 to vector<8x128xf32>
    %83 = arith.mulf %82, %81 : vector<8x128xf32>
    %cst_33 = arith.constant 0.707106769 : f32
    %84 = vector.broadcast %cst_33 : f32 to vector<8x128xf32>
    %85 = arith.mulf %81, %84 : vector<8x128xf32>
    %86 = math.erf %85 : vector<8x128xf32>
    %cst_34 = arith.constant 1.000000e+00 : f32
    %87 = vector.broadcast %cst_34 : f32 to vector<8x128xf32>
    %88 = arith.addf %87, %86 : vector<8x128xf32>
    %89 = arith.mulf %83, %88 : vector<8x128xf32>
    %90 = arith.addf %44, %89 : vector<8x128xf32>
    %91 = arith.truncf %90 : vector<8x128xf32> to vector<8x128xbf16>
    %c0_35 = arith.constant 0 : index
    %c0_36 = arith.constant 0 : index
    %92 = vector.load %arg8[%c0_35, %c0_36] : memref<128x32xf32, #tpu.memory_space<vmem>>, vector<128x32xf32>
    %93 = arith.truncf %92 : vector<128x32xf32> to vector<128x32xbf16>
    %cst_37 = arith.constant dense<0.000000e+00> : vector<8x32xf32>
    %94 = tpu.matmul %91, %93, %cst_37 {dimension_numbers = #tpu.dot_dimension_numbers<[1], [0], [0], [1], [0, 0, 1, 1], [], []>} : vector<8x128xbf16>, vector<128x32xbf16>, vector<8x32xf32> -> vector<8x32xf32>
    %95 = vector.broadcast %6 : vector<1x32xf32> to vector<8x32xf32>
    %96 = arith.addf %94, %95 : vector<8x32xf32>
    %97 = tpu.transpose %96, [1, 0] : vector<8x32xf32> -> vector<32x8xf32>
    %c0_38 = arith.constant 0 : index
    %c0_39 = arith.constant 0 : index
    %c0_40 = arith.constant 0 : index
    %98 = vector.load %arg10[%c0_38, %c0_39, %c0_40] : memref<1x32x8xf32, #tpu.memory_space<vmem>>, vector<1x32x8xf32>
    %99 = vector.shape_cast %98 : vector<1x32x8xf32> to vector<32x8xf32>
    %100 = vector.shape_cast %97 : vector<32x8xf32> to vector<1x32x8xf32>
    tpu.vector_store %arg10[%c0_38, %c0_39, %c0_40], %100 {strides = array<i32>} : memref<1x32x8xf32, #tpu.memory_space<vmem>>, vector<1x32x8xf32>,
    return
  }
  func.func @transform_0(%arg0: i32) -> (i32, i32, i32) {
    %c0_i32 = arith.constant 0 : i32
    %c0_i32_0 = arith.constant 0 : i32
    %c0_i32_1 = arith.constant 0 : i32
    return %arg0, %c0_i32, %c0_i32_0 : i32, i32, i32
  }
  func.func @transform_1(%arg0: i32) -> (i32, i32) {
    %c0_i32 = arith.constant 0 : i32
    %c0_i32_0 = arith.constant 0 : i32
    %c0_i32_1 = arith.constant 0 : i32
    return %c0_i32, %c0_i32_0 : i32, i32
  }
  func.func @transform_2(%arg0: i32) -> (i32, i32) {
    %c0_i32 = arith.constant 0 : i32
    %c0_i32_0 = arith.constant 0 : i32
    %c0_i32_1 = arith.constant 0 : i32
    return %c0_i32, %c0_i32_0 : i32, i32
  }
  func.func @transform_3(%arg0: i32) -> (i32, i32) {
    %c0_i32 = arith.constant 0 : i32
    %c0_i32_0 = arith.constant 0 : i32
    %c0_i32_1 = arith.constant 0 : i32
    return %c0_i32, %c0_i32_0 : i32, i32
  }
  func.func @transform_4(%arg0: i32) -> (i32, i32) {
    %c0_i32 = arith.constant 0 : i32
    %c0_i32_0 = arith.constant 0 : i32
    %c0_i32_1 = arith.constant 0 : i32
    return %c0_i32, %c0_i32_0 : i32, i32
  }
  func.func @transform_5(%arg0: i32) -> (i32, i32) {
    %c0_i32 = arith.constant 0 : i32
    %c0_i32_0 = arith.constant 0 : i32
    %c0_i32_1 = arith.constant 0 : i32
    return %c0_i32, %c0_i32_0 : i32, i32
  }
  func.func @transform_6(%arg0: i32) -> (i32, i32) {
    %c0_i32 = arith.constant 0 : i32
    %c0_i32_0 = arith.constant 0 : i32
    %c0_i32_1 = arith.constant 0 : i32
    return %c0_i32, %c0_i32_0 : i32, i32
  }
  func.func @transform_7(%arg0: i32) -> (i32, i32) {
    %c0_i32 = arith.constant 0 : i32
    %c0_i32_0 = arith.constant 0 : i32
    %c0_i32_1 = arith.constant 0 : i32
    return %c0_i32, %c0_i32_0 : i32, i32
  }
  func.func @transform_8(%arg0: i32) -> (i32, i32) {
    %c0_i32 = arith.constant 0 : i32
    %c0_i32_0 = arith.constant 0 : i32
    %c0_i32_1 = arith.constant 0 : i32
    return %c0_i32, %c0_i32_0 : i32, i32
  }
  func.func @transform_9(%arg0: i32) -> (i32, i32, i32) {
    %c0_i32 = arith.constant 0 : i32
    %c0_i32_0 = arith.constant 0 : i32
    %c0_i32_1 = arith.constant 0 : i32
    return %arg0, %c0_i32, %c0_i32_0 : i32, i32, i32
  }
}

</mosaic_0001>

<bundles_post_ra>
// kernel: tpu_custom_call.1
= control target key start
LH: loop header
LB: loop body
LE: loop exit
PB: predicated region body
PF: predicated region fallthrough
CT: control target
= control target key end

     0   :  { %s752_s30 = smov 0   ;;  %s858_s0 = inlined_call_operand.vmem [shape: f32[2,8,32], index: 0, kind: input, shape index: {}]   ;;  %s859_s1 = inlined_call_operand.vmem [shape: f32[1,32], index: 1, kind: input, shape index: {}]   ;;  %s860_s2 = inlined_call_operand.vmem [shape: f32[1,32], index: 2, kind: input, shape index: {}]   ;;  %s861_s3 = inlined_call_operand.vmem [shape: f32[32,128], index: 3, kind: input, shape index: {}]   ;;  %s862_s4 = inlined_call_operand.vmem [shape: f32[1,128], index: 4, kind: input, shape index: {}]   ;;  %s863_s5 = inlined_call_operand.vmem [shape: f32[3,128], index: 5, kind: input, shape index: {}]   ;;  %s864_s6 = inlined_call_operand.vmem [shape: f32[1,128], index: 6, kind: input, shape index: {}]   ;;  %s865_s7 = inlined_call_operand.vmem [shape: f32[128,32], index: 7, kind: input, shape index: {}]   ;;  %s866_s8 = inlined_call_operand.vmem [shape: f32[1,32], index: 8, kind: input, shape index: {}]   ;;  %s867_s9 = inlined_call_operand.vmem [shape: f32[2,32,8], index: 9, kind: output, shape index: {}]  }
   0x1 LB: > { %s656_s10 = sadd.s32 4294967295, %s699_s30   ;;  %p660_p0 = scmp.ge.s32.totalorder %s699_s30, 1  ;;  %s699_s30 = sphi %s752_s30, %s19_s30  }
   0x2   : > { %p286_p1 = scmp.lt.s32.totalorder %s699_s30, 3 }
   0x4   : > { %p287_p2 = pnand %p660_p0, %p286_p1 }
   0x5   : > { %p321_p3 = scmp.lt.s32.totalorder (!%p287_p2), %s656_s10, 1 }
   0x6   : > { %290 = sbr.rel (%p287_p2) target bundleno = 848 (0x350), region = 56 }
   0xb   : > { %s869_s10 = smov (!%p321_p3, %s656_s10), 1  ;;  %vm338_vm0 = vcmask 261120   ;;  %v701_v2 = vmov 32.0   ;;  %v379_v14 = vld [vmem:[%s861_s3 + $0x10] sm:$0xff]  ;;  %v380_v15 = vld [vmem:[%s861_s3 + $0x18] sm:$0xff]  ;;  %v377_v17 = vld [vmem:[%s861_s3] sm:$0xff] }
   0xc   : > { %s661_s11 = sshll.u32 %s869_s10, 3  ;;  %685 = vrcp.f32 %v701_v2  ;;  %v382_v16 = vpack.c.bf16 %v380_v15, %v379_v14  ;;  %v378_v18 = vld [vmem:[%s861_s3 + $0x8] sm:$0xff]  ;;  %v680_v29 = vld [vmem:[%s859_s1] ss:$0 sm:$0xff]  ;;  %v538_v57 = vld [vmem:[%s865_s7 + $0x70] sm:$0xff]  ;;  %s669_s29 = sshll.u32 %s869_s10, 5 }
   0xd   : > { %s324_s14 = scalar_lea.vmem %s858_s0, %s661_s11  ;;  %v381_v19 = vpack.c.bf16 %v378_v18, %v377_v17  ;;  %v681_v32 = vld [vmem:[%s860_s2] ss:$0 sm:$0xff]  ;;  %v539_v58 = vld [vmem:[%s865_s7 + $0x78] sm:$0xff]  ;;  %v537_v62 = vld [vmem:[%s865_s7 + $0x68] sm:$0xff]  ;;  %s329_s13 = scalar_lea.vmem %s867_s9, %s669_s29  ;;  %vm596_vm15 = vcmask 64512  }
   0xe   : > { %v331_v0 = vld [vmem:[%s324_s14] sm:$0xff]  ;;  %395 = vmatpush.bf16.msra.mxu0 %v382_v16  ;;  %v547_v61 = vpack.c.bf16 %v539_v58, %v538_v57  ;;  %v534_v2 = vld [vmem:[%s865_s7 + $0x50] sm:$0xff] }
   0xf   : > { %v339_v1 = vsel %vm338_vm0, %v331_v0, 0.0  ;;  %v682_v36 = vld [vmem:[%s862_s4] ss:$0 sm:$0xff] }
  0x10   : > { %340 = vadd.xlane.f32.xlu0 %v339_v1  ;;  %v536_v59 = vld [vmem:[%s865_s7 + $0x60] sm:$0xff]  ;;  %551 = vmatpush.bf16.msra.mxu1 %v547_v61 }
  0x12   : > { %v686_v3 = vpop.eup %685  ;;  %396 = vmatpush.bf16.msra.mxu0 %v381_v19 }
  0x13   : > { %v343_v4 = vmul.f32 32.0, %v686_v3  ;;  %vm347_vm1 = vweird.f32 %v686_v3 }
  0x15   : > { %v344_v5 = vsub.f32 1.0, %v343_v4 }
  0x17   : > { %v345_v6 = vmul.f32 %v686_v3, %v344_v5 }
  0x19   : > { %v346_v7 = vadd.f32 %v686_v3, %v345_v6  ;;  %v532_v6 = vld [vmem:[%s865_s7 + $0x40] sm:$0xff] }
  0x1b   : > { %v348_v8 = vsel %vm347_vm1, %v686_v3, %v346_v7  ;;  %v535_v3 = vld [vmem:[%s865_s7 + $0x58] sm:$0xff]  ;;  %v533_v7 = vld [vmem:[%s865_s7 + $0x48] sm:$0xff] }
  0x1c   : > { %v545_v4 = vpack.c.bf16 %v535_v3, %v534_v2 }
  0x83   : > { %v341_v9 = vpop.xlane.xlu0 %340 }
  0x84   : > { %v349_v10 = vmul.f32 %v348_v8, %v341_v9  ;;  %v544_v9 = vpack.c.bf16 %v533_v7, %v532_v6 }
  0x86   : > { %v350_v11 = vsub.f32 %v331_v0, %v349_v10  ;;  %v546_v0 = vpack.c.bf16 %v537_v62, %v536_v59 }
  0x88   : > { %v351_v12 = vmul.f32 %v350_v11, %v350_v11  ;;  %552 = vmatpush.bf16.msra.mxu1 %v546_v0 }
  0x8a   : > { %v352_v13 = vsel %vm338_vm0, %v351_v12, 0.0  ;;  %v530_v12 = vld [vmem:[%s865_s7 + $0x30] sm:$0xff] }
  0x8b   : > { %353 = vadd.xlane.f32.xlu0 %v352_v13  ;;  %v531_v13 = vld [vmem:[%s865_s7 + $0x38] sm:$0xff] }
  0x8c   : > { %553 = vmatpush.bf16.msra.mxu1 %v545_v4  ;;  %v543_v16 = vpack.c.bf16 %v531_v13, %v530_v12 }
  0x90   : > { %554 = vmatpush.bf16.msra.mxu1 %v544_v9 }
  0x94   : > { %555 = vmatpush.bf16.msra.mxu1 %v543_v16 }
  0xfe   : > { %v354_v20 = vpop.xlane.xlu0 %353 }
  0xff   : > { %v355_v21 = vmul.f32 %v354_v20, %v348_v8  ;;  %v528_v20 = vld [vmem:[%s865_s7 + $0x20] sm:$0xff] }
 0x101   : > { %v356_v22 = vadd.f32 1e-05, %v355_v21  ;;  %v529_v21 = vld [vmem:[%s865_s7 + $0x28] sm:$0xff] }
 0x103   : > { %687 = vrsqrt.f32 %v356_v22  ;;  %vm363_vm3 = vweird.f32 %v356_v22 }
 0x109   : > { %v688_v23 = vpop.eup %687 }
 0x10a   : > { %v358_v24 = vmul.f32 %v688_v23, %v356_v22  ;;  %vm364_vm2 = vweird.f32 %v688_v23  ;;  %v446_v22 = vlaneseq }
 0x10b   : > { %vm365_vm4 = vmor %vm363_vm3, %vm364_vm2 }
 0x10c   : > { %v359_v25 = vmul.f32 %v688_v23, %v358_v24 }
 0x10e   : > { %v360_v26 = vmul.f32 0.5, %v359_v25  ;;  %v542_v25 = vpack.c.bf16 %v529_v21, %v528_v20 }
 0x110   : > { %v361_v27 = vsub.f32 1.5, %v360_v26  ;;  %556 = vmatpush.bf16.msra.mxu1 %v542_v25 }
 0x112   : > { %v362_v28 = vmul.f32 %v688_v23, %v361_v27 }
 0x114   : > { %v366_v30 = vsel %vm365_vm4, %v688_v23, %v362_v28  ;;  %v526_v28 = vld [vmem:[%s865_s7 + $0x10] sm:$0xff] }
 0x115   : > { %v367_v31 = vmul.f32 %v366_v30, %v350_v11 }
 0x117   : > { %v371_v33 = vmul.f32 %v680_v29, %v367_v31  ;;  %v527_v29 = vld [vmem:[%s865_s7 + $0x18] sm:$0xff]  ;;  %v447_v31 = vshrl.u32 %v446_v22, 7 }
 0x119   : > { %v375_v34 = vadd.f32 %v681_v32, %v371_v33  ;;  %v541_v33 = vpack.c.bf16 %v527_v29, %v526_v28 }
 0x11b   : > { %v376_v35 = vpack.c.bf16 %v375_v34, %v375_v34  ;;  %557 = vmatpush.bf16.msra.mxu1 %v541_v33 }
 0x11d   : > { %664 = vmatmul.msk.bf16.vlgmr.msra.gmra.mxu0 %vm338_vm0, %v376_v35  ;;  %v524_v35 = vld [vmem:[%s865_s7] sm:$0xff] }
 0x19a   : > { %v398_v37 = vpop.f32.mrf.mxu0 }
 0x19b   : > { %v790_v38 = vadd.f32 %v682_v36, %v398_v37  ;;  %v525_v36 = vld [vmem:[%s865_s7 + $0x8] sm:$0xff]  ;;  %v452_v37 = vand.u32 7, %v447_v31 }
 0x19d   : > { %v403_v39 = vmul.f32 0.70710677, %v790_v38  ;;  %vm460_vm9 = vcmp.eq.s32.totalorder %v452_v37, 0  ;;  %vm463_vm10 = vcmp.eq.s32.totalorder %v452_v37, 7 }
 0x19f   : > { %v404_v40 = vmul.f32 %v403_v39, %v403_v39 }
 0x1a1   : > { %v405_v41 = vmin.f32 %v404_v40, 16.0  ;;  %v402_v40 = vmul.f32 0.5, %v790_v38  ;;  %v683_v38 = vld [vmem:[%s864_s6] ss:$0 sm:$0xff] }
 0x1a2   : > { %v400_v42 = vpop.f32.mrf.mxu0 }
 0x1a3   : > { %v406_v43 = vmul.f32 2.1237322e-06, %v405_v41  ;;  %v417_v44 = vmul.f32 3.8918573e-05, %v405_v41  ;;  %v540_v42 = vpack.c.bf16 %v525_v36, %v524_v35 }
 0x1a5   : > { %v407_v45 = vadd.f32 0.00028619796, %v406_v43  ;;  %v418_v46 = vadd.f32 0.001143296, %v417_v44  ;;  %558 = vmatpush.bf16.msra.mxu1 %v540_v42 }
 0x1a7   : > { %v408_v47 = vmul.f32 %v407_v45, %v405_v41  ;;  %v419_v48 = vmul.f32 %v418_v46, %v405_v41 }
 0x1a9   : > { %v420_v49 = vadd.f32 0.014752088, %v419_v48  ;;  %v409_v50 = vadd.f32 0.0036580483, %v408_v47 }
 0x1ab   : > { %v421_v51 = vmul.f32 %v420_v49, %v405_v41  ;;  %v410_v53 = vmul.f32 %v409_v50, %v405_v41 }
 0x1ad   : > { %v422_v52 = vadd.f32 0.112945676, %v421_v51  ;;  %v411_v56 = vadd.f32 0.05243302, %v410_v53 }
 0x1af   : > { %v423_v54 = vmul.f32 %v422_v52, %v405_v41  ;;  %v412_v1 = vmul.f32 %v411_v56, %v405_v41 }
 0x1b1   : > { %v424_v55 = vadd.f32 0.4994258, %v423_v54  ;;  %v413_v5 = vadd.f32 0.18741608, %v412_v1 }
 0x1b3   : > { %v425_v60 = vmul.f32 %v424_v55, %v405_v41  ;;  %v414_v10 = vmul.f32 %v413_v5, %v405_v41 }
 0x1b5   : > { %v426_v63 = vadd.f32 1.0, %v425_v60  ;;  %v415_v17 = vadd.f32 1.1283791, %v414_v10 }
 0x1b7   : > { %689 = vrcp.f32 %v426_v63  ;;  %v438_v15 = vand.u32 2147483648, %v426_v63  ;;  %v436_v19 = vand.u32 2147483647, %v426_v63  ;;  %vm432_vm6 = vweird.f32 %v426_v63 }
 0x1b8   : > { %v416_v26 = vmul.f32 %v415_v17, %v403_v39  ;;  %v337_v39 = vld [vmem:[%s863_s5] sm:$0x7] }
 0x1b9   : > { %v439_v24 = vor.u32 1.1754944e-38, %v438_v15  ;;  %vm437_vm8 = vcmp.eq.f32.partialorder %v436_v19, 8.507059e+37  ;;  %v468_v44 = vperm.slane %v337_v39, 1  ;;  %v466_v45 = vperm.slane %v337_v39, 0 }
 0x1ba   : > { %v471_v48 = vperm.slane %v337_v39, 2 }
 0x1bd   : > { %v690_v8 = vpop.eup %689 }
 0x1be   : > { %v428_v11 = vmul.f32 %v690_v8, %v426_v63  ;;  %vm433_vm5 = vweird.f32 %v690_v8 }
 0x1bf   : > { %vm434_vm7 = vmor %vm432_vm6, %vm433_vm5 }
 0x1c0   : > { %v429_v14 = vsub.f32 1.0, %v428_v11 }
 0x1c2   : > { %v430_v18 = vmul.f32 %v690_v8, %v429_v14 }
 0x1c4   : > { %v431_v23 = vadd.f32 %v690_v8, %v430_v18 }
 0x1c6   : > { %v435_v27 = vsel %vm434_vm7, %v690_v8, %v431_v23 }
 0x1c7   : > { %v440_v30 = vsel %vm437_vm8, %v439_v24, %v435_v27 }
 0x1c8   : > { %v441_v32 = vmul.f32 %v440_v30, %v416_v26 }
 0x1ca   : > { %v665_v34 = vclamps-f32 %v441_v32, 1.0 }
 0x1cc   : > { %v444_v41 = vadd.f32 1.0, %v665_v34  ;;  %v684_v34 = vld [vmem:[%s866_s8] ss:$0 sm:$0xff] }
 0x1ce   : > { %v445_v43 = vmul.f32 %v444_v41, %v402_v40 }
 0x1d0   : > { %v461_v46 = vrot.slane %v445_v43, 7  ;;  %v464_v47 = vrot.slane %v445_v43, 1  ;;  %v469_v51 = vmul.f32 %v468_v44, %v445_v43 }
 0x1d2   : > { %v462_v49 = vsel %vm460_vm9, 0.0, %v461_v46  ;;  %v465_v50 = vsel %vm463_vm10, 0.0, %v464_v47 }
 0x1d3   : > { %v467_v52 = vmul.f32 %v466_v45, %v462_v49  ;;  %v472_v54 = vmul.f32 %v471_v48, %v465_v50 }
 0x1d5   : > { %v470_v53 = vadd.f32 %v469_v51, %v467_v52 }
 0x1d7   : > { %v473_v55 = vadd.f32 %v472_v54, %v470_v53 }
 0x1d9   : > { %v477_v56 = vadd.f32 %v683_v38, %v473_v55 }
 0x1db   : > { %v479_v57 = vmul.f32 0.70710677, %v477_v56  ;;  %v478_v29 = vmul.f32 0.5, %v477_v56 }
 0x1dd   : > { %v480_v58 = vmul.f32 %v479_v57, %v479_v57 }
 0x1df   : > { %v481_v59 = vmin.f32 %v480_v58, 16.0 }
 0x1e1   : > { %v482_v60 = vmul.f32 2.1237322e-06, %v481_v59  ;;  %v493_v61 = vmul.f32 3.8918573e-05, %v481_v59 }
 0x1e3   : > { %v483_v62 = vadd.f32 0.00028619796, %v482_v60  ;;  %v494_v63 = vadd.f32 0.001143296, %v493_v61 }
 0x1e5   : > { %v484_v0 = vmul.f32 %v483_v62, %v481_v59  ;;  %v495_v1 = vmul.f32 %v494_v63, %v481_v59 }
 0x1e7   : > { %v496_v2 = vadd.f32 0.014752088, %v495_v1  ;;  %v485_v3 = vadd.f32 0.0036580483, %v484_v0 }
 0x1e9   : > { %v497_v4 = vmul.f32 %v496_v2, %v481_v59  ;;  %v486_v6 = vmul.f32 %v485_v3, %v481_v59 }
 0x1eb   : > { %v498_v5 = vadd.f32 0.112945676, %v497_v4  ;;  %v487_v9 = vadd.f32 0.05243302, %v486_v6 }
 0x1ed   : > { %v499_v7 = vmul.f32 %v498_v5, %v481_v59  ;;  %v488_v12 = vmul.f32 %v487_v9, %v481_v59 }
 0x1ef   : > { %v500_v8 = vadd.f32 0.4994258, %v499_v7  ;;  %v489_v13 = vadd.f32 0.18741608, %v488_v12 }
 0x1f1   : > { %v501_v10 = vmul.f32 %v500_v8, %v481_v59  ;;  %v490_v15 = vmul.f32 %v489_v13, %v481_v59 }
 0x1f3   : > { %v502_v11 = vadd.f32 1.0, %v501_v10  ;;  %v491_v19 = vadd.f32 1.1283791, %v490_v15 }
 0x1f5   : > { %691 = vrcp.f32 %v502_v11  ;;  %v514_v18 = vand.u32 2147483648, %v502_v11  ;;  %v512_v21 = vand.u32 2147483647, %v502_v11  ;;  %vm508_vm12 = vweird.f32 %v502_v11 }
 0x1f6   : > { %v492_v24 = vmul.f32 %v491_v19, %v479_v57 }
 0x1f7   : > { %v515_v23 = vor.u32 1.1754944e-38, %v514_v18  ;;  %vm513_vm14 = vcmp.eq.f32.partialorder %v512_v21, 8.507059e+37 }
 0x1fb   : > { %v692_v14 = vpop.eup %691 }
 0x1fc   : > { %v504_v16 = vmul.f32 %v692_v14, %v502_v11  ;;  %vm509_vm11 = vweird.f32 %v692_v14 }
 0x1fd   : > { %vm510_vm13 = vmor %vm508_vm12, %vm509_vm11 }
 0x1fe   : > { %v505_v17 = vsub.f32 1.0, %v504_v16 }
 0x200   : > { %v506_v20 = vmul.f32 %v692_v14, %v505_v17 }
 0x202   : > { %v507_v22 = vadd.f32 %v692_v14, %v506_v20 }
 0x204   : > { %v511_v25 = vsel %vm510_vm13, %v692_v14, %v507_v22 }
 0x205   : > { %v516_v26 = vsel %vm513_vm14, %v515_v23, %v511_v25 }
 0x206   : > { %v517_v27 = vmul.f32 %v516_v26, %v492_v24 }
 0x208   : > { %v666_v28 = vclamps-f32 %v517_v27, 1.0 }
 0x20a   : > { %v520_v30 = vadd.f32 1.0, %v666_v28 }
 0x20c   : > { %v521_v31 = vmul.f32 %v520_v30, %v478_v29 }
 0x20e   : > { %v522_v32 = vadd.f32 %v521_v31, %v445_v43 }
 0x210   : > { %v523_v33 = vpack.c.bf16 %v522_v32, %v522_v32 }
 0x212   : > { %559 = vmatmul.bf16.vlgmr.msra.gmra.mxu1 %v523_v33 }
 0x28f   : > { %v560_v35 = vpop.f32.mrf.mxu1 }
 0x290   : > { %v561_v36 = vadd.f32 %v684_v34, %v560_v35 }
 0x292   : > { %564 = vxpose.xlu1.b32.start.end [1/1] (short) (narrow) %v561_v36, 32 }
 0x297   : > { %v562_v37 = vpop.f32.mrf.mxu1 }
 0x336   : > { %v580_v39 = vpop.trf.xlu1 }
 0x337   : > { %597 = vst.msk [vmem:[%s329_s13] sm:$0xff] %vm596_vm15, %v580_v39 }
 0x33e   : > { %v581_v40 = vpop.trf.xlu1 }
 0x33f   : > { %598 = vst.msk [vmem:[%s329_s13 + $0x8] sm:$0xff] %vm596_vm15, %v581_v40 }
 0x346   : > { %v582_v41 = vpop.trf.xlu1 }
 0x347   : > { %599 = vst.msk [vmem:[%s329_s13 + $0x10] sm:$0xff] %vm596_vm15, %v582_v41 }
 0x34e   : > { %v583_v42 = vpop.trf.xlu1 }
 0x34f   : > { %600 = vst.msk [vmem:[%s329_s13 + $0x18] sm:$0xff] %vm596_vm15, %v583_v42 }
 0x350 PF: > { %s19_s30 = sadd.s32 1, %s699_s30  }
 0x351   : > { %p16_p4 = scmp.ge.s32.totalorder %s19_s30, 4  }
 0x353   :  { %18 = sbr.rel (!%p16_p4) target bundleno = 1 (0x1), region = 86 }

</bundles_post_ra>
